<compile_context>
chip_gen: v5e
topology: v5e:2x2
jax: 0.10.0
libtpu: 0.0.40
codegen_flags: <defaults>
</compile_context>

<pallas_src>
import functools

import jax
import jax.numpy as jnp
from jax.experimental import pallas as pl
from jax.experimental.pallas import tpu as pltpu


def _dot(w, x, dot_dtype):
    """MXU matmul with f32 accumulation; optionally cast operands (bf16 path)."""
    if dot_dtype is not None:
        w = w.astype(dot_dtype)
        x = x.astype(dot_dtype)
    return jnp.dot(w, x, preferred_element_type=jnp.float32)


def _resconv_kernel(x_ref, w1_ref, b1_ref, w2_ref, b2_ref, w3_ref, b3_ref,
                    o_ref, *, c_out, has_proj, dot_dtype):
    """ResConvBlock on a (b_blk, C_in, TP) tile; pixels on the lane axis.

    has_proj=True : w1_ref is the stacked [w1; w_skip] (2*C_out, C_in) weight and
                    b1_ref the stacked bias, so conv1 + skip share one MXU pass.
    has_proj=False: identity skip, no skip matmul at all.
    """
    w1 = w1_ref[...]
    w2 = w2_ref[...]
    w3 = w3_ref[...]
    b1 = b1_ref[...].astype(jnp.float32)
    b2 = b2_ref[...].astype(jnp.float32)
    b3 = b3_ref[...].astype(jnp.float32)

    for b in range(x_ref.shape[0]):          # static, unrolled batch block
        x = x_ref[b]                          # (C_in, TP)
        f = _dot(w1, x, dot_dtype) + b1       # (2*C_out or C_out, TP), f32
        if has_proj:
            h = jnp.maximum(f[:c_out], 0.0)   # relu(conv1)
            skip = f[c_out:]                  # skip projection (no relu)
        else:
            h = jnp.maximum(f, 0.0)
            skip = x.astype(jnp.float32)      # identity skip
        h = jnp.maximum(_dot(w2, h, dot_dtype) + b2, 0.0)
        h = jnp.maximum(_dot(w3, h, dot_dtype) + b3, 0.0)
        o_ref[b] = (skip + h).astype(o_ref.dtype)


def _vmem_capacity_bytes():
    try:
        return int(pltpu.get_tpu_info().vmem_capacity_bytes)
    except Exception:
        return 64 << 20  # conservative fallback (v7x per-core VMEM)


def _select_tiling(n, p, c_in, c_out, x_itemsize, w_itemsize, has_proj):
    """Pick (pixel_tile, batch_block, vmem_limit_bytes) from the VMEM budget."""
    capacity = _vmem_capacity_bytes()
    budget = int(capacity * 0.75)

    # Resident weights/biases (single-buffered via pl.Buffered(1)).
    if has_proj:
        w_elems = (2 * c_out) * c_in + 2 * c_out + 2 * c_out * c_out + 2 * c_out
    else:
        w_elems = c_out * c_in + c_out + 2 * c_out * c_out + 2 * c_out
    w_bytes = w_elems * w_itemsize

    # Bytes per (batch row x pixel lane):
    #   double-buffered x & out tiles + f32 intermediates (h/skip/x-upcast).
    per_lane = (2 * c_in + 2 * c_out) * x_itemsize + (c_in + 4 * c_out) * 4

    avail = max(budget - w_bytes, 1 << 20)
    lane_cap = max(avail // per_lane, 128)
    lane_cap = min(lane_cap, 8192)           # diminishing BW returns past ~1-4K lanes

    # Pixel tile: whole row if it fits (full-dim block is always legal),
    # otherwise the largest multiple of 128 within budget.
    tp = p if p <= lane_cap else max((lane_cap // 128) * 128, 128)

    # Amortize per-grid-step overhead for tiny images by blocking batch rows,
    # but never collapse the grid below 2 steps (v7x megacore).
    b_blk = 1
    if p <= 512 and n > 1:
        b_blk = int(min(n, max(lane_cap // max(tp, 1), 1), 8))
        while b_blk > 1 and pl.cdiv(n, b_blk) * pl.cdiv(p, tp) < 2:
            b_blk -= 1

    # v7x has 2 TensorCores: make sure both get a grid step when possible.
    if pl.cdiv(n, b_blk) * pl.cdiv(p, tp) < 2 and p >= 256:
        tp = max(((pl.cdiv(p, 2) + 127) // 128) * 128, 128)

    est = w_bytes + b_blk * tp * per_lane
    vmem_limit = int(est * 1.25)
    vmem_limit = max(vmem_limit, min(32 << 20, capacity // 2))
    vmem_limit = min(vmem_limit, int(capacity * 0.9))
    return tp, b_blk, vmem_limit


def res_conv_block_pallas(x_nchw, params, *, use_bf16_dots=None):
    """Apply ResConvBlock to an NCHW input using the Pallas kernel."""
    n, c_in, hgt, wid = x_nchw.shape
    c_out = params["w1t"].shape[0]
    p = hgt * wid
    has_proj = "wst" in params

    # bf16 MXU operands only pay off when the block is matmul-bound; keep exact
    # f32 math for small channel counts (and for non-f32 inputs, pass through).
    if use_bf16_dots is None:
        use_bf16_dots = bool(x_nchw.dtype == jnp.float32 and min(c_in, c_out) >= 256)
    dot_dtype = jnp.bfloat16 if use_bf16_dots else None

    # Fuse conv1 + skip projection into one stacked matmul (single pass over x).
    if has_proj:
        w1 = jnp.concatenate([params["w1t"], params["wst"]], axis=0)  # (2*C_out, C_in)
        b1 = jnp.concatenate([params["b1"], params["bs"]], axis=0)    # (2*C_out, 1)
    else:
        w1, b1 = params["w1t"], params["b1"]
    w2, b2 = params["w2t"], params["b2"]
    w3, b3 = params["w3t"], params["b3"]
    if dot_dtype is not None:
        w1, w2, w3 = (w.astype(dot_dtype) for w in (w1, w2, w3))

    w_itemsize = jnp.dtype(w1.dtype).itemsize
    tp, b_blk, vmem_limit = _select_tiling(
        n, p, c_in, c_out, x_nchw.dtype.itemsize, w_itemsize, has_proj)

    # NCHW -> (N, C_in, H*W): contiguous reshape, no transpose / HBM round trip.
    x3d = x_nchw.reshape(n, c_in, p)

    grid = (pl.cdiv(n, b_blk), pl.cdiv(p, tp))
    tile_map = lambda nb, pb: (nb, 0, pb)
    resident = lambda nb, pb: (0, 0)

    def wspec(shape):
        # Constant index_map -> fetched once; single buffer saves VMEM.
        return pl.BlockSpec(shape, resident, pipeline_mode=pl.Buffered(1))

    kernel = functools.partial(_resconv_kernel, c_out=c_out,
                               has_proj=has_proj, dot_dtype=dot_dtype)

    out3d = pl.pallas_call(
        kernel,
        out_shape=jax.ShapeDtypeStruct((n, c_out, p), x_nchw.dtype),
        grid=grid,
        in_specs=[
            pl.BlockSpec((b_blk, c_in, tp), tile_map),
            wspec(w1.shape), wspec(b1.shape),
            wspec(w2.shape), wspec(b2.shape),
            wspec(w3.shape), wspec(b3.shape),
        ],
        out_specs=pl.BlockSpec((b_blk, c_out, tp), tile_map),
        compiler_params=pltpu.CompilerParams(
            dimension_semantics=("parallel", "parallel"),
            vmem_limit_bytes=vmem_limit),
    )(x3d, w1, b1, w2, b2, w3, b3)

    # (N, C_out, H*W) -> NCHW: free reshape.
    return out3d.reshape(n, c_out, hgt, wid)


def make_params(key, c_in, c_out, dtype=jnp.float32):
    """Synthetic parameters mirroring the nn.Conv2d shapes.

    PyTorch stores 1x1 conv weights as (C_out, C_in, 1, 1); we keep them as
    (C_out, C_in) matrices. Biases are (C_out, 1) so they broadcast over lanes.
    """
    ks = jax.random.split(key, 8)
    s_in = 1.0 / jnp.sqrt(c_in)
    s_out = 1.0 / jnp.sqrt(c_out)
    params = {
        "w1t": jax.random.uniform(ks[0], (c_out, c_in), dtype, -s_in, s_in),
        "b1": jax.random.uniform(ks[1], (c_out, 1), dtype, -s_in, s_in),
        "w2t": jax.random.uniform(ks[2], (c_out, c_out), dtype, -s_out, s_out),
        "b2": jax.random.uniform(ks[3], (c_out, 1), dtype, -s_out, s_out),
        "w3t": jax.random.uniform(ks[4], (c_out, c_out), dtype, -s_out, s_out),
        "b3": jax.random.uniform(ks[5], (c_out, 1), dtype, -s_out, s_out),
    }
    if c_in != c_out:
        params["wst"] = jax.random.uniform(ks[6], (c_out, c_in), dtype, -s_in, s_in)
        params["bs"] = jax.random.uniform(ks[7], (c_out, 1), dtype, -s_in, s_in)
    return params


def res_conv_block_ref(x_nchw, params):
    """Pure-JAX reference (same math as the PyTorch forward)."""
    n, c_in, hgt, wid = x_nchw.shape
    x = x_nchw.reshape(n, c_in, hgt * wid).astype(jnp.float32)

    def conv(w, b, t):
        return (jnp.einsum("oc,ncp->nop", w.astype(jnp.float32), t)
                + b.astype(jnp.float32)[None])

    h = jax.nn.relu(conv(params["w1t"], params["b1"], x))
    h = jax.nn.relu(conv(params["w2t"], params["b2"], h))
    h = jax.nn.relu(conv(params["w3t"], params["b3"], h))
    skip = conv(params["wst"], params["bs"], x) if "wst" in params else x
    out = skip + h
    c_out = out.shape[1]
    return out.reshape(n, c_out, hgt, wid).astype(x_nchw.dtype)


if __name__ == "__main__":
    key = jax.random.PRNGKey(0)
    k_x, k_p, k_p2 = jax.random.split(key, 3)

    # Small shapes: batch=2, in_channels=4, out_channels=8, spatial=16x16.
    N, C_IN, C_OUT, H, W = 2, 4, 8, 16, 16
    x = jax.random.normal(k_x, (N, C_IN, H, W), dtype=jnp.float32)

    # Case 1: projection skip (c_in != c_out) — fused conv1+skip matmul.
    params = make_params(k_p, C_IN, C_OUT)
    out = jax.block_until_ready(res_conv_block_pallas(x, params))
    ref = res_conv_block_ref(x, params)
    assert out.shape == (N, C_OUT, H, W)
    assert jnp.allclose(out, ref, atol=1e-5, rtol=1e-5), "mismatch vs reference (proj skip)"

    # Case 2: identity skip (c_in == c_out) — no skip matmul.
    params_id = make_params(k_p2, C_OUT, C_OUT)
    x_id = jax.random.normal(k_x, (N, C_OUT, H, W), dtype=jnp.float32)
    out_id = jax.block_until_ready(res_conv_block_pallas(x_id, params_id))
    ref_id = res_conv_block_ref(x_id, params_id)
    assert out_id.shape == (N, C_OUT, H, W)
    assert jnp.allclose(out_id, ref_id, atol=1e-5, rtol=1e-5), "mismatch vs reference (identity skip)"

    print("KERNEL_OK")
</pallas_src>

<mosaic_0001>
module attributes {stable_mosaic.version = 11 : i64} {
  func.func @_resconv_kernel(%arg0: i32, %arg1: i32, %arg2: memref<1x4x256xf32, #tpu.memory_space<vmem>>, %arg3: memref<16x4xf32, #tpu.memory_space<vmem>>, %arg4: memref<16x1xf32, #tpu.memory_space<vmem>>, %arg5: memref<8x8xf32, #tpu.memory_space<vmem>>, %arg6: memref<8x1xf32, #tpu.memory_space<vmem>>, %arg7: memref<8x8xf32, #tpu.memory_space<vmem>>, %arg8: memref<8x1xf32, #tpu.memory_space<vmem>>, %arg9: memref<1x8x256xf32, #tpu.memory_space<vmem>>) attributes {dimension_semantics = [#tpu.dimension_semantics<parallel>, #tpu.dimension_semantics<parallel>], iteration_bounds = array<i64: 2, 1>, scalar_prefetch = 0 : i64, scratch_operands = 0 : i64, tpu.core_type = #tpu.core_type<tc>, window_params = [{transform_indices = @transform_0, window_bounds = array<i64: 1, 4, 256>}, {pipeline_mode = #tpu.pipeline_mode<synchronous>, transform_indices = @transform_1, window_bounds = array<i64: 16, 4>}, {pipeline_mode = #tpu.pipeline_mode<synchronous>, transform_indices = @transform_2, window_bounds = array<i64: 16, 1>}, {pipeline_mode = #tpu.pipeline_mode<synchronous>, transform_indices = @transform_3, window_bounds = array<i64: 8, 8>}, {pipeline_mode = #tpu.pipeline_mode<synchronous>, transform_indices = @transform_4, window_bounds = array<i64: 8, 1>}, {pipeline_mode = #tpu.pipeline_mode<synchronous>, transform_indices = @transform_5, window_bounds = array<i64: 8, 8>}, {pipeline_mode = #tpu.pipeline_mode<synchronous>, transform_indices = @transform_6, window_bounds = array<i64: 8, 1>}, {transform_indices = @transform_7, window_bounds = array<i64: 1, 8, 256>}]} {
    %c0 = arith.constant 0 : index
    %c0_0 = arith.constant 0 : index
    %0 = vector.load %arg3[%c0, %c0_0] : memref<16x4xf32, #tpu.memory_space<vmem>>, vector<16x4xf32>
    %c0_1 = arith.constant 0 : index
    %c0_2 = arith.constant 0 : index
    %1 = vector.load %arg5[%c0_1, %c0_2] : memref<8x8xf32, #tpu.memory_space<vmem>>, vector<8x8xf32>
    %c0_3 = arith.constant 0 : index
    %c0_4 = arith.constant 0 : index
    %2 = vector.load %arg7[%c0_3, %c0_4] : memref<8x8xf32, #tpu.memory_space<vmem>>, vector<8x8xf32>
    %c0_5 = arith.constant 0 : index
    %c0_6 = arith.constant 0 : index
    %3 = vector.load %arg4[%c0_5, %c0_6] : memref<16x1xf32, #tpu.memory_space<vmem>>, vector<16x1xf32>
    %c0_7 = arith.constant 0 : index
    %c0_8 = arith.constant 0 : index
    %4 = vector.load %arg6[%c0_7, %c0_8] : memref<8x1xf32, #tpu.memory_space<vmem>>, vector<8x1xf32>
    %c0_9 = arith.constant 0 : index
    %c0_10 = arith.constant 0 : index
    %5 = vector.load %arg8[%c0_9, %c0_10] : memref<8x1xf32, #tpu.memory_space<vmem>>, vector<8x1xf32>
    %c0_11 = arith.constant 0 : index
    %c0_12 = arith.constant 0 : index
    %c0_13 = arith.constant 0 : index
    %6 = vector.load %arg2[%c0_11, %c0_12, %c0_13] : memref<1x4x256xf32, #tpu.memory_space<vmem>>, vector<1x4x256xf32>
    %7 = vector.shape_cast %6 : vector<1x4x256xf32> to vector<4x256xf32>
    %cst = arith.constant dense<0.000000e+00> : vector<16x256xf32>
    %8 = tpu.matmul %0, %7, %cst {dimension_numbers = #tpu.dot_dimension_numbers<[1], [0], [0], [1], [0, 0, 1, 1], [], []>} : vector<16x4xf32>, vector<4x256xf32>, vector<16x256xf32> -> vector<16x256xf32>
    %9 = vector.broadcast %3 : vector<16x1xf32> to vector<16x256xf32>
    %10 = arith.addf %8, %9 : vector<16x256xf32>
    %11 = vector.extract_strided_slice %10 {offsets = [0, 0], sizes = [8, 256], strides = [1, 1]} : vector<16x256xf32> to vector<8x256xf32>
    %cst_14 = arith.constant 0.000000e+00 : f32
    %12 = vector.broadcast %cst_14 : f32 to vector<8x256xf32>
    %13 = arith.maximumf %11, %12 : vector<8x256xf32>
    %14 = vector.extract_strided_slice %10 {offsets = [8, 0], sizes = [8, 256], strides = [1, 1]} : vector<16x256xf32> to vector<8x256xf32>
    %cst_15 = arith.constant dense<0.000000e+00> : vector<8x256xf32>
    %15 = tpu.matmul %1, %13, %cst_15 {dimension_numbers = #tpu.dot_dimension_numbers<[1], [0], [0], [1], [0, 0, 1, 1], [], []>} : vector<8x8xf32>, vector<8x256xf32>, vector<8x256xf32> -> vector<8x256xf32>
    %16 = vector.broadcast %4 : vector<8x1xf32> to vector<8x256xf32>
    %17 = arith.addf %15, %16 : vector<8x256xf32>
    %cst_16 = arith.constant 0.000000e+00 : f32
    %18 = vector.broadcast %cst_16 : f32 to vector<8x256xf32>
    %19 = arith.maximumf %17, %18 : vector<8x256xf32>
    %cst_17 = arith.constant dense<0.000000e+00> : vector<8x256xf32>
    %20 = tpu.matmul %2, %19, %cst_17 {dimension_numbers = #tpu.dot_dimension_numbers<[1], [0], [0], [1], [0, 0, 1, 1], [], []>} : vector<8x8xf32>, vector<8x256xf32>, vector<8x256xf32> -> vector<8x256xf32>
    %21 = vector.broadcast %5 : vector<8x1xf32> to vector<8x256xf32>
    %22 = arith.addf %20, %21 : vector<8x256xf32>
    %cst_18 = arith.constant 0.000000e+00 : f32
    %23 = vector.broadcast %cst_18 : f32 to vector<8x256xf32>
    %24 = arith.maximumf %22, %23 : vector<8x256xf32>
    %25 = arith.addf %14, %24 : vector<8x256xf32>
    %c0_19 = arith.constant 0 : index
    %c0_20 = arith.constant 0 : index
    %c0_21 = arith.constant 0 : index
    %26 = vector.load %arg9[%c0_19, %c0_20, %c0_21] : memref<1x8x256xf32, #tpu.memory_space<vmem>>, vector<1x8x256xf32>
    %27 = vector.shape_cast %26 : vector<1x8x256xf32> to vector<8x256xf32>
    %28 = vector.shape_cast %25 : vector<8x256xf32> to vector<1x8x256xf32>
    tpu.vector_store %arg9[%c0_19, %c0_20, %c0_21], %28 {strides = array<i32>} : memref<1x8x256xf32, #tpu.memory_space<vmem>>, vector<1x8x256xf32>,
    return
  }
  func.func @transform_0(%arg0: i32, %arg1: i32) -> (i32, i32, i32) {
    %c0_i32 = arith.constant 0 : i32
    %c0_i32_0 = arith.constant 0 : i32
    return %arg0, %c0_i32, %arg1 : i32, i32, i32
  }
  func.func @transform_1(%arg0: i32, %arg1: i32) -> (i32, i32) {
    %c0_i32 = arith.constant 0 : i32
    %c0_i32_0 = arith.constant 0 : i32
    %c0_i32_1 = arith.constant 0 : i32
    return %c0_i32, %c0_i32_0 : i32, i32
  }
  func.func @transform_2(%arg0: i32, %arg1: i32) -> (i32, i32) {
    %c0_i32 = arith.constant 0 : i32
    %c0_i32_0 = arith.constant 0 : i32
    %c0_i32_1 = arith.constant 0 : i32
    return %c0_i32, %c0_i32_0 : i32, i32
  }
  func.func @transform_3(%arg0: i32, %arg1: i32) -> (i32, i32) {
    %c0_i32 = arith.constant 0 : i32
    %c0_i32_0 = arith.constant 0 : i32
    %c0_i32_1 = arith.constant 0 : i32
    return %c0_i32, %c0_i32_0 : i32, i32
  }
  func.func @transform_4(%arg0: i32, %arg1: i32) -> (i32, i32) {
    %c0_i32 = arith.constant 0 : i32
    %c0_i32_0 = arith.constant 0 : i32
    %c0_i32_1 = arith.constant 0 : i32
    return %c0_i32, %c0_i32_0 : i32, i32
  }
  func.func @transform_5(%arg0: i32, %arg1: i32) -> (i32, i32) {
    %c0_i32 = arith.constant 0 : i32
    %c0_i32_0 = arith.constant 0 : i32
    %c0_i32_1 = arith.constant 0 : i32
    return %c0_i32, %c0_i32_0 : i32, i32
  }
  func.func @transform_6(%arg0: i32, %arg1: i32) -> (i32, i32) {
    %c0_i32 = arith.constant 0 : i32
    %c0_i32_0 = arith.constant 0 : i32
    %c0_i32_1 = arith.constant 0 : i32
    return %c0_i32, %c0_i32_0 : i32, i32
  }
  func.func @transform_7(%arg0: i32, %arg1: i32) -> (i32, i32, i32) {
    %c0_i32 = arith.constant 0 : i32
    %c0_i32_0 = arith.constant 0 : i32
    return %arg0, %c0_i32, %arg1 : i32, i32, i32
  }
}

</mosaic_0001>

<bundles_post_ra>
// kernel: tpu_custom_call.1
= control target key start
LH: loop header
LB: loop body
LE: loop exit
PB: predicated region body
PF: predicated region fallthrough
CT: control target
= control target key end

     0   :  { %12 = vsyncpa [#allocation3], 0  ;;  %s924_s0 = inlined_call_operand.vmem [shape: f32[2,4,256], index: 0, kind: input, shape index: {}]   ;;  %s925_s1 = inlined_call_operand.vmem [shape: f32[16,4], index: 1, kind: input, shape index: {}]   ;;  %s926_s2 = inlined_call_operand.vmem [shape: f32[16,1], index: 2, kind: input, shape index: {}]   ;;  %s927_s3 = inlined_call_operand.vmem [shape: f32[8,8], index: 3, kind: input, shape index: {}]   ;;  %s928_s4 = inlined_call_operand.vmem [shape: f32[8,1], index: 4, kind: input, shape index: {}]   ;;  %s929_s5 = inlined_call_operand.vmem [shape: f32[8,8], index: 5, kind: input, shape index: {}]   ;;  %s930_s6 = inlined_call_operand.vmem [shape: f32[8,1], index: 6, kind: input, shape index: {}]   ;;  %s931_s7 = inlined_call_operand.hbm [shape: f32[2,8,256], index: 7, kind: output, shape index: {}]  }
   0x1   :  { %14 = vsyncpa [#allocation3 + $0x1], 0  ;;  %s795_s24 = smov 0   ;;  %s797_s25 = smov 0  }
   0x2   :  { %s799_s26 = smov 0   ;;  %s801_s27 = smov 0  }
   0x3   :  { %s803_s28 = smov 0   ;;  %s805_s29 = smov 0  }
   0x4 LB: > { %s591_s30 = sadd.s32 4294967295, %s752_s29   ;;  %s592_s8 = sadd.s32 4294967294, %s752_s29   ;;  %s752_s29 = sphi %s805_s29, %s20_s29   ;;  %s748_s28 = sphi %s803_s28, %s938_s28   ;;  %s744_s27 = sphi %s801_s27, %s937_s27   ;;  %s740_s26 = sphi %s799_s26, %s936_s26   ;;  %s736_s25 = sphi %s797_s25, %s935_s25   ;;  %s732_s24 = sphi %s795_s24, %s934_s24  }
   0x5   : > { %s32_s9 = sadd.s32 1, %s748_s28  ;;  %s195_s10 = sadd.s32 1, %s740_s26 }
   0x6   : > { %p34_p0 = scmp.ge.s32.totalorder %s32_s9, 2  ;;  %p205_p1 = scmp.ne.s32.totalorder %s740_s26, %s736_s25 }
   0x7   : > { %p206_p2 = scmp.eq.s32.totalorder %s591_s30, 1  ;;  %p211_p3 = scmp.ne.s32.totalorder %s736_s25, %s732_s24 }
   0x8   : > { %s940_s9 = smov (%p34_p0, %s32_s9), 0  ;;  %p212_p5 = scmp.eq.s32.totalorder %s592_s8, 1 }
   0x9   : > { %p835_p4 = por %p206_p2, %p205_p1  ;;  %s190_s12 = ssub.s32 %s748_s28, %s940_s9 }
   0xa   : > { %p595_p6 = scmp.ge.s32.totalorder %s752_s29, 1  ;;  %p193_p7 = scmp.eq.s32.totalorder %s190_s12, 0 }
   0xb   : > { %p842_p8 = por %p212_p5, %p211_p3  ;;  %p261_p9 = scmp.lt.s32.totalorder %s752_s29, 3 }
   0xc   : > { %s848_s14 = scalar_select %p193_p7, %s740_s26, %s195_s10  }
   0xd   : > { %p262_p10 = pnand %p595_p6, %p261_p9 }
   0xe   : > { %p298_p11 = scmp.lt.s32.totalorder (!%p262_p10), %s744_s27, 1  ;;  %s294_s23 = sand.u32 (!%p262_p10), 1, %s736_s25  }
   0xf   : > { %265 = sbr.rel (%p262_p10) target bundleno = 444 (0x1bc), region = 48  ;;  %s596_s30 = sshll.u32 (!%p262_p10), %s294_s23, 4 }
  0x10   : > { %s615_s8 = sshll.u32 (!%p262_p10), %s744_s27, 4  ;;  %s296_s16 = scalar_lea.vmem (!%p262_p10), [#allocation2], %s596_s30 }
  0x11   : > { %s510_s15 = scalar_lea.hbm (!%p262_p10), %s931_s7, %s615_s8  ;;  %s694_s30 = scalar_lea.hbm (!%p262_p10), %s931_s7, 32 }
  0x14   : > { %v312_v0 = vld [vmem:[%s926_s2] sm:$0xff]  ;;  %v754_v1 = vmov 0   ;;  %s299_s17 = scalar_select %p298_p11, %s744_s27, 1  ;;  %vm338_vm0 = vcmask 1043456   ;;  %vm331_vm1 = vcmask 31744   ;;  %vm396_vm2 = vcmask 64512  }
  0x15   : > { %672 = vset.pattern.permute.xlu0 %v754_v1  ;;  %673 = vset.pattern.permute.xlu1 %v754_v1  ;;  %v314_v3 = vld [vmem:[%s928_s4] sm:$0xff]  ;;  %v309_v15 = vld [vmem:[%s925_s1 + $0x8] sm:$0xff]  ;;  %s497_s27 = scalar_lea.sflag [#allocation3], %s294_s23 }
  0x16   : > { %319 = vperm.xlu0 %672, %v312_v0   ;;  %s614_s18 = sshll.u32 %s299_s17, 3  ;;  %v308_v4 = vld [vmem:[%s925_s1] sm:$0xff]  ;;  %v313_v17 = vld [vmem:[%s926_s2 + $0x8] sm:$0xff]  ;;  %s512_s17 = sshll.u32 %s296_s16, 4  ;;  %s513_s17 = int_to_ptr.vmem [resolvable:$true] %s512_s17 }
  0x17   : > { %s305_s21 = scalar_lea.vmem %s924_s0, %s614_s18  ;;  %v310_v14 = vld [vmem:[%s927_s3] sm:$0xff]  ;;  %s514_s18 = sshll.u32 %s510_s15, 4  ;;  %s515_s18 = int_to_ptr.hbm [resolvable:$true] %s514_s18 }
  0x18   : > { %v316_v2 = vld [vmem:[%s305_s21] sm:$0xff]  ;;  %s688_s19 = sshra.s32 %s515_s18, 4  ;;  %s689_s19 = int_to_ptr.hbm [resolvable:$true] %s688_s19 }
  0x19   : > { %328 = vst [vmem:[#allocation1] ss:$2 sm:$0xff] %v316_v2  ;;  %v315_v16 = vld [vmem:[%s930_s6] sm:$0xff]  ;;  %s690_s20 = scalar_lea.hbm %s689_s19, 16  ;;  %p695_p1 = scmp.lt.s32.totalorder %s689_s19, %s931_s7 }
  0x1a   : > { %444 = vperm.xlu1 %673, %v315_v16   ;;  %v311_v25 = vld [vmem:[%s929_s5] sm:$0xff]  ;;  %p691_p12 = scmp.ne.s32.totalorder %s689_s19, %s690_s20  ;;  %p696_p2 = scmp.lt.s32.totalorder %s694_s30, %s690_s20 }
  0x1c   : > { %p692_p13 = pnand %p691_p12, %p835_p4  ;;  %p697_p3 = por %p696_p2, %p695_p1 }
  0x1e   : > { %393 = vperm.xlu0 %672, %v314_v3   ;;  %p693_p0 = pneg %p692_p13 }
  0x20   : > { %v329_v5 = vld.sshfl [vmem:[#allocation1] sm:$0xff pattern:$0x75316420]  ;;  %v330_v6 = vld.sshfl [vmem:[#allocation1 + $0x8] sm:$0xff pattern:$0x75316420]  ;;  %p698_p5 = pnand %p697_p3, %p693_p0 }
  0x21   : > { %599 = vmatpush.msk.msra.mxu0 %vm338_vm0, %v329_v5  ;;  %602 = vmatpush.msk.msra.mxu1 %vm338_vm0, %v330_v6 }
  0x22   : > { %600 = vmatmul.msk.f32.vlgmr.msra.gmra.mxu0 %vm331_vm1, %v308_v4  ;;  %603 = vmatmul.msk.f32.vlgmr.msra.gmra.mxu1 %vm331_vm1, %v308_v4 }
  0x23   : > { %324 = vperm.xlu1 %673, %v313_v17  }
  0x2a   : > { %601 = vmatmul.msk.f32.gmra.mxu0 %vm331_vm1, %v309_v15  ;;  %604 = vmatmul.msk.f32.gmra.mxu1 %vm331_vm1, %v309_v15 }
  0x88   : > { %v320_v7 = vpop.permute.xlu0 %319 }
  0x8c   : > { %v445_v26 = vpop.permute.xlu1 %444 }
  0x90   : > { %v394_v18 = vpop.permute.xlu0 %393 }
  0x95   : > { %v325_v27 = vpop.permute.xlu1 %324 }
  0x9f   : > { %v360_v8 = vpop.f32.mrf.mxu0  ;;  %v383_v9 = vpop.f32.mrf.mxu1 }
  0xa0   : > { %v361_v10 = vadd.f32 %v360_v8, %v320_v7  ;;  %v384_v11 = vadd.f32 %v383_v9, %v320_v7 }
  0xa2   : > { %v389_v12 = vmax.f32 %v361_v10, 0.0  ;;  %v390_v13 = vmax.f32 %v384_v11, 0.0 }
  0xa4   : > { %415 = vmatpush.msra.mxu2 %v389_v12  ;;  %435 = vmatpush.msra.mxu3 %v390_v13 }
  0xa5   : > { %605 = vmatmul.msk.f32.vlgmr.msra.gmra.mxu2 %vm396_vm2, %v310_v14  ;;  %606 = vmatmul.msk.f32.vlgmr.msra.gmra.mxu3 %vm396_vm2, %v310_v14 }
  0xa7   : > { %v363_v28 = vpop.f32.mrf.mxu0  ;;  %v386_v29 = vpop.f32.mrf.mxu1 }
  0xa8   : > { %v364_v36 = vadd.f32 %v363_v28, %v325_v27  ;;  %v387_v37 = vadd.f32 %v386_v29, %v325_v27 }
 0x128   : > { %v417_v19 = vpop.f32.mrf.mxu2  ;;  %v437_v20 = vpop.f32.mrf.mxu3 }
 0x129   : > { %v418_v21 = vadd.f32 %v417_v19, %v394_v18  ;;  %v438_v22 = vadd.f32 %v437_v20, %v394_v18 }
 0x12b   : > { %v440_v23 = vmax.f32 %v418_v21, 0.0  ;;  %v441_v24 = vmax.f32 %v438_v22, 0.0 }
 0x12d   : > { %465 = vmatpush.msrb.mxu2 %v440_v23  ;;  %485 = vmatpush.msrb.mxu3 %v441_v24 }
 0x12e   : > { %607 = vmatmul.msk.f32.vlgmr.msrb.gmra.mxu2 %vm396_vm2, %v311_v25  ;;  %608 = vmatmul.msk.f32.vlgmr.msrb.gmra.mxu3 %vm396_vm2, %v311_v25 }
 0x1b1   : > { %v467_v30 = vpop.f32.mrf.mxu2  ;;  %v487_v31 = vpop.f32.mrf.mxu3 }
 0x1b2   : > { %v468_v32 = vadd.f32 %v467_v30, %v445_v26  ;;  %v488_v33 = vadd.f32 %v487_v31, %v445_v26 }
 0x1b4   : > { %v490_v34 = vmax.f32 %v468_v32, 0.0  ;;  %v491_v35 = vmax.f32 %v488_v33, 0.0 }
 0x1b6   : > { %v492_v38 = vadd.f32 %v490_v34, %v364_v36  ;;  %v493_v39 = vadd.f32 %v491_v35, %v387_v37 }
 0x1b8   : > { %494 = vst [vmem:[%s296_s16] sm:$0xff] %v492_v38 }
 0x1b9   : > { %495 = vst [vmem:[%s296_s16 + $0x8] sm:$0xff] %v493_v39 }
 0x1ba   : > { %701 = shalt.err (!%p698_p5)
}
 0x1bb   : > { %616 = dma.vmem_to_hbm [thread:$0]  (%p835_p4), %s513_s17, 256, %s515_s18, %s497_s27  }
 0x1bc PF: > { %p622_p6 = scmp.ge.s32.totalorder %s752_s29, 2  ;;  %s526_s23 = sand.u32 1, %s732_s24  }
 0x1bd   : > { %s527_s12 = scalar_lea.sflag [#allocation3], %s526_s23 }
 0x1be   : > { %p619_p7 = pnand %p622_p6, %p842_p8 }
 0x1c0   : > { %p620_p9 = pneg %p619_p7 }
 0x1c2   : > { %727 = dma.done.wait (%p620_p9), %s527_s12, 256  }
 0x1c3   : > { %729 = vsyncadd (%p620_p9), %s527_s12, 4294967040  ;;  %s20_s29 = sadd.s32 1, %s752_s29   ;;  %s934_s24 = smov %s736_s25 }
 0x1c4   : > { %p17_p10 = scmp.ge.s32.totalorder %s20_s29, 4   ;;  %s935_s25 = smov %s740_s26 }
 0x1c5   : > { %s936_s26 = smov %s848_s14  ;;  %s937_s27 = smov %s748_s28 }
 0x1c6   : > { %s938_s28 = smov %s940_s9  ;;  %19 = sbr.rel (!%p17_p10) target bundleno = 4 (0x4), region = 83 }
 0x1cb   :  { %533 = vsyncpa [#allocation3], 1 }
 0x1cc   :  { %535 = vsyncpa [#allocation3 + $0x1], 1 }

</bundles_post_ra>
